<compile_context>
chip_gen: v7x
topology: tpu7x:2x2x1
jax: 0.10.0
libtpu: 0.0.40
codegen_flags: <defaults>
</compile_context>

<pallas_src>
import math

import jax
import jax.numpy as jnp
from jax.experimental import pallas as pl
from jax.experimental.pallas import tpu as pltpu

IN = 3    # input_size  = 1 + 1 + 1
HID = 4   # hidden_size
# param packing offsets inside the f32[21] SMEM vector:
#   w1[i, j] -> i*HID + j   (0..11)
#   b1[j]    -> 3*HID + j   (12..15)
#   w2[j]    -> 4*HID + j   (16..19)
#   b2       -> 5*HID       (20)


def policy_mlp_kernel(p_ref, x_ref, o_ref):
    # p_ref: SMEM f32[21]  (all weights/biases as scalars)
    # x_ref: VMEM f32[3, TB] feature-major tile; batch is lane-dense
    # o_ref: VMEM f32[1, TB] lane-dense output tile
    x = x_ref[...]                         # one contiguous lane-dense load
    x0 = x[0:1, :]                         # (1, TB)
    x1 = x[1:2, :]
    x2 = x[2:3, :]

    # accumulate output pre-activation; start from b2 (hoisted scalar broadcast)
    z = jnp.full(x0.shape, p_ref[5 * HID], dtype=jnp.float32)

    # 4 hidden units, statically unrolled: pure VPU broadcast mul-adds + 1 tanh each
    for j in range(HID):
        pre = (p_ref[0 * HID + j] * x0
               + p_ref[1 * HID + j] * x1
               + p_ref[2 * HID + j] * x2
               + p_ref[3 * HID + j])                  # + b1[j]
        z = z + p_ref[4 * HID + j] * jnp.tanh(pre)    # + w2[j] * h_j

    # sigmoid(z) = 0.5 * (tanh(0.5 * z) + 1): single EUP transcendental
    o_ref[...] = (0.5 * (jnp.tanh(0.5 * z) + 1.0)).astype(o_ref.dtype)


def _round_up(n, m):
    return ((n + m - 1) // m) * m


def policy_nn_forward(x, w1, b1, w2, b2, *, block_b=512):
    """x: (B, 3) float32 -> (B, 1) float32 (same semantics as the PyTorch module)."""
    B = x.shape[0]

    # Pack all 21 parameters into one SMEM-resident f32 vector.
    params = jnp.concatenate(
        [w1.reshape(-1), b1.reshape(-1), w2.reshape(-1), b2.reshape(-1)]
    ).astype(jnp.float32)

    # Feature-major layout: batch on the lane axis (layout plumbing in the wrapper).
    xt = x.astype(jnp.float32).T                       # (3, B)
    bb = min(block_b, _round_up(B, 128))               # lane tile, multiple of 128
    Bp = _round_up(B, bb)
    if Bp != B:
        xt = jnp.pad(xt, ((0, 0), (0, Bp - B)))        # pad garbage lanes, sliced off below
    grid = (Bp // bb,)

    out = pl.pallas_call(
        policy_mlp_kernel,
        out_shape=jax.ShapeDtypeStruct((1, Bp), jnp.float32),
        grid=grid,
        in_specs=[
            pl.BlockSpec(memory_space=pltpu.MemorySpace.SMEM),  # params: whole array in SMEM
            pl.BlockSpec((IN, bb), lambda i: (0, i)),           # x tile, lane-dense
        ],
        out_specs=pl.BlockSpec((1, bb), lambda i: (0, i)),      # lane-dense output
        compiler_params=pltpu.CompilerParams(
            dimension_semantics=("parallel",)),                 # megacore / dual-TC sharding
    )(params, xt)

    return out[0, :B].reshape(B, 1)


def init_params(key):
    """PyTorch-style nn.Linear init: U(-1/sqrt(fan_in), 1/sqrt(fan_in)).
       Weights stored as (in_features, out_features) so y = x @ W + b."""
    k1, k2, k3, k4 = jax.random.split(key, 4)
    bnd1 = 1.0 / math.sqrt(IN)
    bnd2 = 1.0 / math.sqrt(HID)
    w1 = jax.random.uniform(k1, (IN, HID), jnp.float32, -bnd1, bnd1)
    b1 = jax.random.uniform(k2, (HID,), jnp.float32, -bnd1, bnd1)
    w2 = jax.random.uniform(k3, (HID, 1), jnp.float32, -bnd2, bnd2)
    b2 = jax.random.uniform(k4, (1,), jnp.float32, -bnd2, bnd2)
    return w1, b1, w2, b2


if __name__ == "__main__":
    key = jax.random.PRNGKey(0)
    kp, kx = jax.random.split(key)
    w1, b1, w2, b2 = init_params(kp)

    ok = True
    # B=8: single grid step with lane padding; B=1000: 2-step "parallel" grid (block=512).
    for B in (8, 1000):
        x = jax.random.normal(jax.random.fold_in(kx, B), (B, IN), jnp.float32)
        out = jax.block_until_ready(policy_nn_forward(x, w1, b1, w2, b2))

        # Pure-JAX reference (identical math to the PyTorch module)
        ref = jax.nn.sigmoid(jnp.tanh(x @ w1 + b1.reshape(1, -1)) @ w2 + b2.reshape(1, -1))
        ok &= (out.shape == (B, 1))
        ok &= bool(jnp.allclose(out, ref, atol=1e-5, rtol=1e-5))

    assert ok
    print("KERNEL_OK")
</pallas_src>

<mosaic_0001>
module attributes {stable_mosaic.version = 11 : i64} {
  func.func @policy_mlp_kernel(%arg0: i32, %arg1: memref<21xf32, #tpu.memory_space<smem>>, %arg2: memref<3x128xf32, #tpu.memory_space<vmem>>, %arg3: memref<1x128xf32, #tpu.memory_space<vmem>>) attributes {dimension_semantics = [#tpu.dimension_semantics<parallel>], iteration_bounds = array<i64: 1>, scalar_prefetch = 0 : i64, scratch_operands = 0 : i64, tpu.core_type = #tpu.core_type<tc>, window_params = [{transform_indices = @transform_0, window_bounds = array<i64: 21>}, {transform_indices = @transform_1, window_bounds = array<i64: 3, 128>}, {transform_indices = @transform_2, window_bounds = array<i64: 1, 128>}]} {
    %c0 = arith.constant 0 : index
    %c0_0 = arith.constant 0 : index
    %0 = vector.load %arg2[%c0, %c0_0] : memref<3x128xf32, #tpu.memory_space<vmem>>, vector<3x128xf32>
    %1 = vector.extract_strided_slice %0 {offsets = [0, 0], sizes = [1, 128], strides = [1, 1]} : vector<3x128xf32> to vector<1x128xf32>
    %2 = vector.extract_strided_slice %0 {offsets = [1, 0], sizes = [1, 128], strides = [1, 1]} : vector<3x128xf32> to vector<1x128xf32>
    %3 = vector.extract_strided_slice %0 {offsets = [2, 0], sizes = [1, 128], strides = [1, 1]} : vector<3x128xf32> to vector<1x128xf32>
    %c20 = arith.constant 20 : index
    %4 = memref.load %arg1[%c20] : memref<21xf32, #tpu.memory_space<smem>>
    %5 = vector.broadcast %4 : f32 to vector<1x128xf32>
    %c0_1 = arith.constant 0 : index
    %6 = memref.load %arg1[%c0_1] : memref<21xf32, #tpu.memory_space<smem>>
    %7 = vector.broadcast %6 : f32 to vector<1x128xf32>
    %8 = arith.mulf %7, %1 : vector<1x128xf32>
    %c4 = arith.constant 4 : index
    %9 = memref.load %arg1[%c4] : memref<21xf32, #tpu.memory_space<smem>>
    %10 = vector.broadcast %9 : f32 to vector<1x128xf32>
    %11 = arith.mulf %10, %2 : vector<1x128xf32>
    %12 = arith.addf %8, %11 : vector<1x128xf32>
    %c8 = arith.constant 8 : index
    %13 = memref.load %arg1[%c8] : memref<21xf32, #tpu.memory_space<smem>>
    %14 = vector.broadcast %13 : f32 to vector<1x128xf32>
    %15 = arith.mulf %14, %3 : vector<1x128xf32>
    %16 = arith.addf %12, %15 : vector<1x128xf32>
    %c12 = arith.constant 12 : index
    %17 = memref.load %arg1[%c12] : memref<21xf32, #tpu.memory_space<smem>>
    %18 = vector.broadcast %17 : f32 to vector<1x128xf32>
    %19 = arith.addf %16, %18 : vector<1x128xf32>
    %c16 = arith.constant 16 : index
    %20 = memref.load %arg1[%c16] : memref<21xf32, #tpu.memory_space<smem>>
    %21 = math.tanh %19 : vector<1x128xf32>
    %22 = vector.broadcast %20 : f32 to vector<1x128xf32>
    %23 = arith.mulf %22, %21 : vector<1x128xf32>
    %24 = arith.addf %5, %23 : vector<1x128xf32>
    %c1 = arith.constant 1 : index
    %25 = memref.load %arg1[%c1] : memref<21xf32, #tpu.memory_space<smem>>
    %26 = vector.broadcast %25 : f32 to vector<1x128xf32>
    %27 = arith.mulf %26, %1 : vector<1x128xf32>
    %c5 = arith.constant 5 : index
    %28 = memref.load %arg1[%c5] : memref<21xf32, #tpu.memory_space<smem>>
    %29 = vector.broadcast %28 : f32 to vector<1x128xf32>
    %30 = arith.mulf %29, %2 : vector<1x128xf32>
    %31 = arith.addf %27, %30 : vector<1x128xf32>
    %c9 = arith.constant 9 : index
    %32 = memref.load %arg1[%c9] : memref<21xf32, #tpu.memory_space<smem>>
    %33 = vector.broadcast %32 : f32 to vector<1x128xf32>
    %34 = arith.mulf %33, %3 : vector<1x128xf32>
    %35 = arith.addf %31, %34 : vector<1x128xf32>
    %c13 = arith.constant 13 : index
    %36 = memref.load %arg1[%c13] : memref<21xf32, #tpu.memory_space<smem>>
    %37 = vector.broadcast %36 : f32 to vector<1x128xf32>
    %38 = arith.addf %35, %37 : vector<1x128xf32>
    %c17 = arith.constant 17 : index
    %39 = memref.load %arg1[%c17] : memref<21xf32, #tpu.memory_space<smem>>
    %40 = math.tanh %38 : vector<1x128xf32>
    %41 = vector.broadcast %39 : f32 to vector<1x128xf32>
    %42 = arith.mulf %41, %40 : vector<1x128xf32>
    %43 = arith.addf %24, %42 : vector<1x128xf32>
    %c2 = arith.constant 2 : index
    %44 = memref.load %arg1[%c2] : memref<21xf32, #tpu.memory_space<smem>>
    %45 = vector.broadcast %44 : f32 to vector<1x128xf32>
    %46 = arith.mulf %45, %1 : vector<1x128xf32>
    %c6 = arith.constant 6 : index
    %47 = memref.load %arg1[%c6] : memref<21xf32, #tpu.memory_space<smem>>
    %48 = vector.broadcast %47 : f32 to vector<1x128xf32>
    %49 = arith.mulf %48, %2 : vector<1x128xf32>
    %50 = arith.addf %46, %49 : vector<1x128xf32>
    %c10 = arith.constant 10 : index
    %51 = memref.load %arg1[%c10] : memref<21xf32, #tpu.memory_space<smem>>
    %52 = vector.broadcast %51 : f32 to vector<1x128xf32>
    %53 = arith.mulf %52, %3 : vector<1x128xf32>
    %54 = arith.addf %50, %53 : vector<1x128xf32>
    %c14 = arith.constant 14 : index
    %55 = memref.load %arg1[%c14] : memref<21xf32, #tpu.memory_space<smem>>
    %56 = vector.broadcast %55 : f32 to vector<1x128xf32>
    %57 = arith.addf %54, %56 : vector<1x128xf32>
    %c18 = arith.constant 18 : index
    %58 = memref.load %arg1[%c18] : memref<21xf32, #tpu.memory_space<smem>>
    %59 = math.tanh %57 : vector<1x128xf32>
    %60 = vector.broadcast %58 : f32 to vector<1x128xf32>
    %61 = arith.mulf %60, %59 : vector<1x128xf32>
    %62 = arith.addf %43, %61 : vector<1x128xf32>
    %c3 = arith.constant 3 : index
    %63 = memref.load %arg1[%c3] : memref<21xf32, #tpu.memory_space<smem>>
    %64 = vector.broadcast %63 : f32 to vector<1x128xf32>
    %65 = arith.mulf %64, %1 : vector<1x128xf32>
    %c7 = arith.constant 7 : index
    %66 = memref.load %arg1[%c7] : memref<21xf32, #tpu.memory_space<smem>>
    %67 = vector.broadcast %66 : f32 to vector<1x128xf32>
    %68 = arith.mulf %67, %2 : vector<1x128xf32>
    %69 = arith.addf %65, %68 : vector<1x128xf32>
    %c11 = arith.constant 11 : index
    %70 = memref.load %arg1[%c11] : memref<21xf32, #tpu.memory_space<smem>>
    %71 = vector.broadcast %70 : f32 to vector<1x128xf32>
    %72 = arith.mulf %71, %3 : vector<1x128xf32>
    %73 = arith.addf %69, %72 : vector<1x128xf32>
    %c15 = arith.constant 15 : index
    %74 = memref.load %arg1[%c15] : memref<21xf32, #tpu.memory_space<smem>>
    %75 = vector.broadcast %74 : f32 to vector<1x128xf32>
    %76 = arith.addf %73, %75 : vector<1x128xf32>
    %c19 = arith.constant 19 : index
    %77 = memref.load %arg1[%c19] : memref<21xf32, #tpu.memory_space<smem>>
    %78 = math.tanh %76 : vector<1x128xf32>
    %79 = vector.broadcast %77 : f32 to vector<1x128xf32>
    %80 = arith.mulf %79, %78 : vector<1x128xf32>
    %81 = arith.addf %62, %80 : vector<1x128xf32>
    %cst = arith.constant 5.000000e-01 : f32
    %82 = vector.broadcast %cst : f32 to vector<1x128xf32>
    %83 = arith.mulf %82, %81 : vector<1x128xf32>
    %84 = math.tanh %83 : vector<1x128xf32>
    %cst_2 = arith.constant 1.000000e+00 : f32
    %85 = vector.broadcast %cst_2 : f32 to vector<1x128xf32>
    %86 = arith.addf %84, %85 : vector<1x128xf32>
    %cst_3 = arith.constant 5.000000e-01 : f32
    %87 = vector.broadcast %cst_3 : f32 to vector<1x128xf32>
    %88 = arith.mulf %87, %86 : vector<1x128xf32>
    %c0_4 = arith.constant 0 : index
    %c0_5 = arith.constant 0 : index
    %89 = vector.load %arg3[%c0_4, %c0_5] : memref<1x128xf32, #tpu.memory_space<vmem>>, vector<1x128xf32>
    tpu.vector_store %arg3[%c0_4, %c0_5], %88 {strides = array<i32>} : memref<1x128xf32, #tpu.memory_space<vmem>>, vector<1x128xf32>,
    return
  }
  func.func @transform_0(%arg0: i32) -> i32 {
    %c0_i32 = arith.constant 0 : i32
    %c0_i32_0 = arith.constant 0 : i32
    return %c0_i32 : i32
  }
  func.func @transform_1(%arg0: i32) -> (i32, i32) {
    %c0_i32 = arith.constant 0 : i32
    %c0_i32_0 = arith.constant 0 : i32
    return %c0_i32, %arg0 : i32, i32
  }
  func.func @transform_2(%arg0: i32) -> (i32, i32) {
    %c0_i32 = arith.constant 0 : i32
    %c0_i32_0 = arith.constant 0 : i32
    return %c0_i32, %arg0 : i32, i32
  }
}

</mosaic_0001>

<bundles_post_ra>
// kernel: tpu_custom_call.1
= control target key start
LH: loop header
LB: loop body
LE: loop exit
PB: predicated region body
PF: predicated region fallthrough
CT: control target
= control target key end

     0   :  { %7 = vsyncpa [#allocation5], 0  ;;  %s327_s0 = inlined_call_operand.hbm [shape: f32[21], index: 0, kind: input, shape index: {}]   ;;  %s328_s1 = inlined_call_operand.hbm [shape: f32[3,128], index: 1, kind: input, shape index: {}]   ;;  %s329_s2 = inlined_call_operand.hbm [shape: f32[1,128], index: 2, kind: output, shape index: {}]  }
   0x1   :  { %8 = vsyncpa [#allocation3], 0 }
   0x2   :  { %9 = vsyncpa [#allocation4], 0  ;;  %s192_s11 = scalar_lea.hbm %s327_s0, 16 }
   0x3   :  { %p193_p0 = scmp.ne.s32.totalorder %s327_s0, %s192_s11  ;;  %p196_p1 = scmp.lt.u32.totalorder %s192_s11, %s327_s0 }
   0x5   :  { %p198_p2 = pnand %p196_p1, %p193_p0 }
   0x7   :  { %201 = shalt.err (!%p198_p2)
}
   0x8   :  { %s252_s16 = smov [#allocation2]   ;;  %s253_s19 = smov [#allocation6]  }
   0x9   :  { %17 = dma.hbm_to_smem %s327_s0, 16, %s252_s16, [#allocation5]  }
   0xa   :  { %s24_s20 = sshll.u32 %s253_s19, 4  ;;  %s202_s23 = scalar_lea.hbm %s328_s1, 64  ;;  %s25_s20 = int_to_ptr.vmem [resolvable:$true] %s24_s20 }
   0xb   :  { %p203_p3 = scmp.ne.s32.totalorder %s328_s1, %s202_s23  ;;  %p206_p4 = scmp.lt.u32.totalorder %s202_s23, %s328_s1 }
   0xd   :  { %p208_p5 = pnand %p206_p4, %p203_p3 }
   0xf   :  { %211 = shalt.err (!%p208_p5)
}
  0x10   :  { %s212_s28 = scalar_lea.vmem %s25_s20, 64  ;;  %p217_p7 = scmp.lt.s32.totalorder %s25_s20, %s25_s20 }
  0x11   :  { %p213_p6 = scmp.ne.s32.totalorder %s25_s20, %s212_s28  ;;  %p218_p8 = scmp.lt.s32.totalorder %s212_s28, %s212_s28 }
  0x13   :  { %p219_p9 = por %p218_p8, %p217_p7 }
  0x15   :  { %p220_p10 = pnand %p219_p9, %p213_p6 }
  0x17   :  { %223 = shalt.err (!%p220_p10)
}
  0x18   :  { %27 = dma.hbm_to_vmem [thread:$0]  %s328_s1, 64, %s25_s20, [#allocation3]  }
  0x19   :  { %246 = dma.done.wait [#allocation5], 16  }
  0x1a   :  { %247 = vsyncadd [#allocation5], 4294967280 }
  0x1b   :  { %248 = dma.done.wait [#allocation3], 64  }
  0x1c   :  { %249 = vsyncadd [#allocation3], 4294967232 }
  0x1d   :  { %34 = sfence }
  0x1e   :  { %s38_s30 = sld [smem:[#allocation2]]  ;;  %s160_s3 = sld [smem:[#allocation2 + $0x4]]  ;;  %v35_v0 = vld [vmem:[#allocation6] sm:$0x7] }
  0x1f   :  { %s161_s4 = sld [smem:[#allocation2 + $0x8]]  ;;  %s164_s5 = sld [smem:[#allocation2 + $0x1]] }
  0x20   :  { %s165_s6 = sld [smem:[#allocation2 + $0x5]]  ;;  %s294_s7 = sld [smem:[#allocation2 + $0xc]] }
  0x21   :  { %s166_s8 = sld [smem:[#allocation2 + $0x9]]  ;;  %s296_s9 = sld [smem:[#allocation2 + $0xd]] }
  0x22   :  { %s169_s10 = sld [smem:[#allocation2 + $0x2]]  ;;  %s170_s11 = sld [smem:[#allocation2 + $0x6]] }
  0x23   :  { %s298_s1 = sld [smem:[#allocation2 + $0xa]]  ;;  %s300_s12 = sld [smem:[#allocation2 + $0x3]] }
  0x24   :  { %v39_v1 = vstv %s38_s30  ;;  %v42_v2 = vstv %s160_s3  ;;  %s302_s13 = sld [smem:[#allocation2 + $0x7]]  ;;  %s304_s14 = sld [smem:[#allocation2 + $0xb]] }
  0x25   :  { %v49_v3 = vstv %s161_s4  ;;  %v40_v4 = vmul.f32 %v39_v1, %v35_v0  ;;  %v43_v5 = vmul.f32 %v42_v2, %v35_v0  ;;  %v64_v7 = vstv %s164_s5  ;;  %s306_s15 = sld [smem:[#allocation2 + $0xe]]  ;;  %s177_s16 = sld [smem:[#allocation2 + $0xf]] }
  0x26   :  { %v50_v6 = vmul.f32 %v49_v3, %v35_v0  ;;  %v67_v8 = vstv %s165_s6  ;;  %v65_v11 = vmul.f32 %v64_v7, %v35_v0  ;;  %v56_v16 = vstv %s294_s7  ;;  %s163_s17 = sld [smem:[#allocation2 + $0x10]]  ;;  %s159_s18 = sld [smem:[#allocation2 + $0x14]] }
  0x27   :  { %v45_v9 = vrot.slane %v43_v5, 1  ;;  %v68_v12 = vmul.f32 %v67_v8, %v35_v0  ;;  %v74_v13 = vstv %s166_s8  ;;  %v81_v19 = vstv %s296_s9  ;;  %s168_s19 = sld [smem:[#allocation2 + $0x11]]  ;;  %s173_s20 = sld [smem:[#allocation2 + $0x12]] }
  0x28   :  { %v52_v10 = vrot.slane %v50_v6, 2  ;;  %v89_v14 = vstv %s169_s10  ;;  %v75_v18 = vmul.f32 %v74_v13, %v35_v0  ;;  %v92_v21 = vstv %s170_s11  ;;  %s178_s21 = sld [smem:[#allocation2 + $0x13]]  ;;  %s254_s22 = smov [#allocation7]  }
  0x29   :  { %v47_v15 = vadd.f32 %v45_v9, %v40_v4  ;;  %v70_v17 = vrot.slane %v68_v12, 1  ;;  %v90_v20 = vmul.f32 %v89_v14, %v35_v0  ;;  %v99_v22 = vstv %s298_s1  ;;  %s149_s23 = sshll.u32 %s254_s22, 4  ;;  %s150_s23 = int_to_ptr.vmem [resolvable:$true] %s149_s23 }
  0x2a   :  { %v77_v25 = vrot.slane %v75_v18, 2  ;;  %v93_v26 = vmul.f32 %v92_v21, %v35_v0  ;;  %v100_v27 = vmul.f32 %v99_v22, %v35_v0  ;;  %v114_v28 = vstv %s300_s12  ;;  %s224_s24 = scalar_lea.vmem %s150_s23, 16  ;;  %s228_s25 = scalar_lea.vmem %s150_s23, 32 }
  0x2b   :  { %v54_v23 = vadd.f32 %v52_v10, %v47_v15  ;;  %v72_v24 = vadd.f32 %v70_v17, %v65_v11  ;;  %v117_v29 = vstv %s302_s13  ;;  %v124_v30 = vstv %s304_s14  ;;  %p225_p11 = scmp.ne.s32.totalorder %s150_s23, %s224_s24  ;;  %p229_p12 = scmp.lt.s32.totalorder %s150_s23, %s150_s23 }
  0x2c   :  { %v95_v33 = vrot.slane %v93_v26, 1  ;;  %v102_v34 = vrot.slane %v100_v27, 2  ;;  %v115_v35 = vmul.f32 %v114_v28, %v35_v0  ;;  %v118_v36 = vmul.f32 %v117_v29, %v35_v0  ;;  %p230_p13 = scmp.lt.s32.totalorder %s228_s25, %s224_s24 }
  0x2d   :  { %v57_v31 = vadd.f32 %v56_v16, %v54_v23  ;;  %v79_v32 = vadd.f32 %v77_v25, %v72_v24  ;;  %v125_v37 = vmul.f32 %v124_v30, %v35_v0  ;;  %v106_v40 = vstv %s306_s15 }
  0x2e   :  { %v97_v39 = vadd.f32 %v95_v33, %v90_v20  ;;  %v120_v41 = vrot.slane %v118_v36, 1  ;;  %v131_v46 = vstv %s177_s16  ;;  %v60_v49 = vstv %s163_s17  ;;  %p231_p0 = por %p230_p13, %p229_p12 }
  0x2f   :  { %182 = vtanh.f32 %v57_v31  ;;  %v82_v38 = vadd.f32 %v81_v19, %v79_v32  ;;  %v127_v42 = vrot.slane %v125_v37, 2  ;;  %v37_v51 = vstv %s159_s18 }
  0x30   :  { %v104_v43 = vadd.f32 %v102_v34, %v97_v39  ;;  %v122_v44 = vadd.f32 %v120_v41, %v115_v35  ;;  %v85_v52 = vstv %s168_s19  ;;  %v110_v57 = vstv %s173_s20  ;;  %p232_p1 = pnand %p231_p0, %p225_p11 }
  0x31   :  { %184 = vtanh.f32 %v82_v38  ;;  %v135_v61 = vstv %s178_s21 }
  0x32   :  { %v107_v45 = vadd.f32 %v106_v40, %v104_v43  ;;  %v129_v47 = vadd.f32 %v127_v42, %v122_v44 }
  0x34   :  { %186 = vtanh.f32 %v107_v45  ;;  %v132_v48 = vadd.f32 %v131_v46, %v129_v47 }
  0x36   :  { %188 = vtanh.f32 %v132_v48 }
  0x39   :  { %v183_v50 = vpop.eup %182 }
  0x3a   :  { %v61_v53 = vmul.f32 %v183_v50, %v60_v49 }
  0x3b   :  { %v185_v54 = vpop.eup %184 }
  0x3c   :  { %v62_v55 = vadd.f32 %v61_v53, %v37_v51  ;;  %v86_v56 = vmul.f32 %v185_v54, %v85_v52 }
  0x3e   :  { %v87_v58 = vadd.f32 %v86_v56, %v62_v55  ;;  %v187_v59 = vpop.eup %186 }
  0x3f   :  { %v111_v60 = vmul.f32 %v187_v59, %v110_v57 }
  0x40   :  { %v189_v62 = vpop.eup %188 }
  0x41   :  { %v112_v63 = vadd.f32 %v111_v60, %v87_v58  ;;  %v136_v0 = vmul.f32 %v189_v62, %v135_v61 }
  0x43   :  { %v137_v1 = vadd.f32 %v136_v0, %v112_v63 }
  0x45   :  { %v138_v2 = vmul.f32 0.5, %v137_v1 }
  0x47   :  { %190 = vtanh.f32 %v138_v2 }
  0x51   :  { %v191_v3 = vpop.eup %190 }
  0x52   :  { %v140_v4 = vadd.f32 1.0, %v191_v3 }
  0x54   :  { %v141_v5 = vmul.f32 0.5, %v140_v4 }
  0x56   :  { %142 = vst [vmem:[#allocation7] sm:$0x1] %v141_v5 }
  0x57   :  { %235 = shalt.err (!%p232_p1)
}
  0x58   :  { %s236_s28 = scalar_lea.hbm %s329_s2, 16 }
  0x59   :  { %p237_p2 = scmp.ne.s32.totalorder %s329_s2, %s236_s28  ;;  %p240_p3 = scmp.lt.u32.totalorder %s236_s28, %s329_s2 }
  0x5b   :  { %p242_p4 = pnand %p240_p3, %p237_p2 }
  0x5d   :  { %245 = shalt.err (!%p242_p4)
}
  0x5e   :  { %152 = dma.vmem_to_hbm [thread:$0]  %s150_s23, 16, %s329_s2, [#allocation4]  }
  0x5f   :  { %250 = dma.done.wait [#allocation4], 16  }
  0x60   :  { %251 = vsyncadd [#allocation4], 4294967280 }
  0x61   :  { %156 = vsyncpa [#allocation3], 1 }
  0x62   :  { %157 = vsyncpa [#allocation4], 1 }
  0x63   :  { %158 = vsyncpa [#allocation5], 1 }

</bundles_post_ra>
